<compile_context>
chip_gen: v7x
topology: tpu7x:2x2x1
jax: 0.10.0
libtpu: 0.0.40
codegen_flags: <defaults>
</compile_context>

<pallas_src>
import functools

import numpy as np
import jax
import jax.numpy as jnp
from jax import lax
from jax.experimental import pallas as pl
from jax.experimental.pallas import tpu as pltpu

# Model hyper-parameters (small, consistent with the module's forward()).
BATCH = 2
SEQ = 8
INPUT_SIZE = 16
HIDDEN = 32
NUM_CONV_LAYERS = 3
BN_EPS = 1e-5


def _round_up(x, m):
    return (x + m - 1) // m * m


def _encoder_kernel(x_ref, p_ref, o_ref, *, input_size, num_layers,
                    off_wconv, off_bproj, off_bconv, off_mask):
    # x_ref: [B*S, I]; p_ref: packed parameter slab [P, H]; o_ref: [B*S, H].
    BS, H = o_ref.shape
    I = input_size
    L = num_layers

    # Input projection (nn.Linear) on the MXU; input_dropout = identity (eval).
    cur = (jnp.dot(x_ref[...], p_ref[0:I, :], preferred_element_type=jnp.float32)
           + p_ref[off_bproj:off_bproj + 1, :])

    for l in range(L):
        d = 2 ** l  # dilation (== padding) of the kernel_size=3 conv

        # Trace-time boundary masks (rows that would read across a sequence /
        # batch boundary are zeroed == the conv's zero padding).
        m_lo = p_ref[off_mask + BS * l: off_mask + BS * (l + 1), :]
        m_hi = p_ref[off_mask + BS * (L + l): off_mask + BS * (L + l + 1), :]

        # Shifted taps via XLU roll (free slot) + one VPU multiply each.
        x_m = pltpu.roll(cur, shift=d, axis=0) * m_lo        # row t <- cur[t-d]
        x_p = pltpu.roll(cur, shift=BS - d, axis=0) * m_hi   # row t <- cur[t+d]

        # Dilated conv1d (+ folded eval-mode BatchNorm) as ONE fused K=3H dot.
        cat = jnp.concatenate([x_m, cur, x_p], axis=-1)      # [B*S, 3H]
        w = p_ref[off_wconv + 3 * H * l: off_wconv + 3 * H * (l + 1), :]  # [3H, H]
        b = p_ref[off_bconv + l: off_bconv + l + 1, :]                     # [1, H]
        y = jnp.dot(cat, w, preferred_element_type=jnp.float32) + b

        y = jnp.maximum(y, 0.0)   # ReLU; Dropout = identity (eval mode)
        cur = y + cur             # residual connection

    o_ref[...] = cur


def simple_cnn_encoder_forward(x, params):
    """x: [B, S, I] float32 -> [B, S, H] float32 (eval-mode forward)."""
    B, S, I = x.shape
    w_proj, b_proj, conv_w, conv_b, gamma, beta, mean, var = params
    H = w_proj.shape[0]
    L = conv_w.shape[0]
    BS = B * S
    assert 2 ** (L - 1) < S, "largest dilation must stay below the sequence length"

    # ---- trace-time parameter prep (outside the kernel) ----
    wp = w_proj.T                                        # [I, H]
    # Fold eval-mode BatchNorm into the conv weights / bias (output channel).
    scale = gamma * lax.rsqrt(var + BN_EPS)              # [L, H]
    w_taps = jnp.transpose(conv_w, (0, 3, 2, 1))         # [L, 3, in, out]
    w_fused = (w_taps * scale[:, None, None, :]).reshape(L, 3 * H, H)
    cb = (conv_b - mean) * scale + beta                  # [L, H]

    # Zero-padding boundary masks, computed at trace time (pure numpy).
    pos = np.arange(BS) % S
    mask_lo = np.concatenate([(pos >= 2 ** l).astype(np.float32) for l in range(L)])
    mask_hi = np.concatenate([(pos < S - 2 ** l).astype(np.float32) for l in range(L)])

    # Static row offsets inside the single packed parameter slab.
    off_wconv = I
    off_bproj = off_wconv + 3 * H * L
    off_bconv = off_bproj + 1
    off_mask = _round_up(off_bconv + L, 8)               # keep mask blocks 8-aligned
    n_rows = off_mask + 2 * L * BS

    slab = jnp.concatenate([
        wp,                                               # rows [0, I)
        w_fused.reshape(3 * H * L, H),                    # rows [I, I+3HL)
        b_proj[None, :],                                  # row  off_bproj
        cb,                                               # rows off_bconv .. +L
        jnp.zeros((off_mask - (off_bconv + L), H), jnp.float32),   # alignment pad
        jnp.broadcast_to(jnp.asarray(mask_lo)[:, None], (L * BS, H)),
        jnp.broadcast_to(jnp.asarray(mask_hi)[:, None], (L * BS, H)),
    ], axis=0)
    assert slab.shape[0] == n_rows

    flops = 2 * BS * I * H + L * 2 * BS * (3 * H) * H
    bytes_accessed = 4 * (BS * I + n_rows * H + BS * H)

    # Single invocation, no grid: every operand is a full-array VMEM block
    # (total footprint ~70 KiB, far below VMEM on any TPU generation).
    out = pl.pallas_call(
        functools.partial(_encoder_kernel, input_size=I, num_layers=L,
                          off_wconv=off_wconv, off_bproj=off_bproj,
                          off_bconv=off_bconv, off_mask=off_mask),
        out_shape=jax.ShapeDtypeStruct((BS, H), jnp.float32),
        in_specs=[pl.BlockSpec(memory_space=pltpu.MemorySpace.VMEM),
                  pl.BlockSpec(memory_space=pltpu.MemorySpace.VMEM)],
        out_specs=pl.BlockSpec(memory_space=pltpu.MemorySpace.VMEM),
        cost_estimate=pl.CostEstimate(flops=flops, transcendentals=0,
                                      bytes_accessed=bytes_accessed),
    )(x.reshape(BS, I), slab)
    return out.reshape(B, S, H)


def make_params(key, input_size=INPUT_SIZE, hidden=HIDDEN,
                num_layers=NUM_CONV_LAYERS):
    """Deterministic synthetic parameters in PyTorch layout."""
    ks = jax.random.split(key, 8)
    w_proj = 0.1 * jax.random.normal(ks[0], (hidden, input_size), jnp.float32)
    b_proj = 0.1 * jax.random.normal(ks[1], (hidden,), jnp.float32)
    # nn.Conv1d(H, H, 3) per layer: torch weight [out, in, 3].
    conv_w = 0.05 * jax.random.normal(
        ks[2], (num_layers, hidden, hidden, 3), jnp.float32)
    conv_b = 0.05 * jax.random.normal(ks[3], (num_layers, hidden), jnp.float32)
    # Non-trivial BatchNorm running stats so the fold is actually exercised.
    bn_gamma = 1.0 + 0.1 * jax.random.normal(ks[4], (num_layers, hidden), jnp.float32)
    bn_beta = 0.1 * jax.random.normal(ks[5], (num_layers, hidden), jnp.float32)
    bn_mean = 0.1 * jax.random.normal(ks[6], (num_layers, hidden), jnp.float32)
    bn_var = 1.0 + 0.1 * jax.random.uniform(ks[7], (num_layers, hidden), jnp.float32)
    return (w_proj, b_proj, conv_w, conv_b, bn_gamma, bn_beta, bn_mean, bn_var)


def reference_forward(x, params):
    """Pure-JAX reference mirroring the PyTorch forward (eval mode)."""
    w_proj, b_proj, conv_w, conv_b, gamma, beta, mean, var = params
    B, S, _ = x.shape
    cur = jnp.einsum('bsi,hi->bsh', x, w_proj) + b_proj
    L = conv_w.shape[0]
    for l in range(L):
        d = 2 ** l
        xp = jnp.pad(cur, ((0, 0), (d, d), (0, 0)))
        y = (jnp.einsum('bsh,oh->bso', xp[:, 0:S, :], conv_w[l, :, :, 0])
             + jnp.einsum('bsh,oh->bso', xp[:, d:d + S, :], conv_w[l, :, :, 1])
             + jnp.einsum('bsh,oh->bso', xp[:, 2 * d:2 * d + S, :], conv_w[l, :, :, 2])
             + conv_b[l])
        y = (y - mean[l]) * lax.rsqrt(var[l] + BN_EPS) * gamma[l] + beta[l]
        y = jnp.maximum(y, 0.0)
        cur = y + cur
    return cur


if __name__ == "__main__":
    key = jax.random.PRNGKey(0)
    k_x, k_p = jax.random.split(key)
    x = jax.random.normal(k_x, (BATCH, SEQ, INPUT_SIZE), jnp.float32)
    params = make_params(k_p)

    fwd = jax.jit(simple_cnn_encoder_forward)
    out = jax.block_until_ready(fwd(x, params))
    ref = reference_forward(x, params)

    assert out.shape == (BATCH, SEQ, HIDDEN), out.shape
    assert jnp.allclose(out, ref, atol=1e-4, rtol=1e-4), "mismatch vs reference"
    print("KERNEL_OK")
</pallas_src>

<mosaic_0001>
module attributes {stable_mosaic.version = 11 : i64} {
  func.func @_encoder_kernel(%arg0: memref<16x16xf32, #tpu.memory_space<vmem>>, %arg1: memref<408x32xf32, #tpu.memory_space<vmem>>, %arg2: memref<16x32xf32, #tpu.memory_space<vmem>>) attributes {dimension_semantics = [], scalar_prefetch = 0 : i64, scratch_operands = 0 : i64, tpu.core_type = #tpu.core_type<tc>} {
    %c0 = arith.constant 0 : index
    %c0_0 = arith.constant 0 : index
    %0 = vector.load %arg0[%c0, %c0_0] : memref<16x16xf32, #tpu.memory_space<vmem>>, vector<16x16xf32>
    %c0_1 = arith.constant 0 : index
    %c0_2 = arith.constant 0 : index
    %1 = vector.load %arg1[%c0_1, %c0_2] : memref<408x32xf32, #tpu.memory_space<vmem>>, vector<16x32xf32>
    %cst = arith.constant dense<0.000000e+00> : vector<16x32xf32>
    %2 = tpu.matmul %0, %1, %cst {dimension_numbers = #tpu.dot_dimension_numbers<[1], [0], [0], [1], [0, 0, 1, 1], [], []>} : vector<16x16xf32>, vector<16x32xf32>, vector<16x32xf32> -> vector<16x32xf32>
    %c304 = arith.constant 304 : index
    %c0_3 = arith.constant 0 : index
    %3 = vector.load %arg1[%c304, %c0_3] : memref<408x32xf32, #tpu.memory_space<vmem>>, vector<1x32xf32>
    %4 = vector.broadcast %3 : vector<1x32xf32> to vector<16x32xf32>
    %5 = arith.addf %2, %4 : vector<16x32xf32>
    %c312 = arith.constant 312 : index
    %c0_4 = arith.constant 0 : index
    %6 = vector.load %arg1[%c312, %c0_4] : memref<408x32xf32, #tpu.memory_space<vmem>>, vector<16x32xf32>
    %c360 = arith.constant 360 : index
    %c0_5 = arith.constant 0 : index
    %7 = vector.load %arg1[%c360, %c0_5] : memref<408x32xf32, #tpu.memory_space<vmem>>, vector<16x32xf32>
    %c1_i32 = arith.constant 1 : i32
    %8 = tpu.dynamic_rotate %5 by %c1_i32 dim 0 : vector<16x32xf32>, i32 -> vector<16x32xf32>
    %9 = arith.mulf %8, %6 : vector<16x32xf32>
    %c15_i32 = arith.constant 15 : i32
    %10 = tpu.dynamic_rotate %5 by %c15_i32 dim 0 : vector<16x32xf32>, i32 -> vector<16x32xf32>
    %11 = arith.mulf %10, %7 : vector<16x32xf32>
    %12 = tpu.concatenate %9, %5, %11 in 1 : vector<16x32xf32>, vector<16x32xf32>, vector<16x32xf32> -> vector<16x96xf32>
    %c16 = arith.constant 16 : index
    %c0_6 = arith.constant 0 : index
    %13 = vector.load %arg1[%c16, %c0_6] : memref<408x32xf32, #tpu.memory_space<vmem>>, vector<96x32xf32>
    %c305 = arith.constant 305 : index
    %c0_7 = arith.constant 0 : index
    %14 = vector.load %arg1[%c305, %c0_7] : memref<408x32xf32, #tpu.memory_space<vmem>>, vector<1x32xf32>
    %cst_8 = arith.constant dense<0.000000e+00> : vector<16x32xf32>
    %15 = tpu.matmul %12, %13, %cst_8 {dimension_numbers = #tpu.dot_dimension_numbers<[1], [0], [0], [1], [0, 0, 1, 1], [], []>} : vector<16x96xf32>, vector<96x32xf32>, vector<16x32xf32> -> vector<16x32xf32>
    %16 = vector.broadcast %14 : vector<1x32xf32> to vector<16x32xf32>
    %17 = arith.addf %15, %16 : vector<16x32xf32>
    %cst_9 = arith.constant 0.000000e+00 : f32
    %18 = vector.broadcast %cst_9 : f32 to vector<16x32xf32>
    %19 = arith.maximumf %17, %18 : vector<16x32xf32>
    %20 = arith.addf %19, %5 : vector<16x32xf32>
    %c328 = arith.constant 328 : index
    %c0_10 = arith.constant 0 : index
    %21 = vector.load %arg1[%c328, %c0_10] : memref<408x32xf32, #tpu.memory_space<vmem>>, vector<16x32xf32>
    %c376 = arith.constant 376 : index
    %c0_11 = arith.constant 0 : index
    %22 = vector.load %arg1[%c376, %c0_11] : memref<408x32xf32, #tpu.memory_space<vmem>>, vector<16x32xf32>
    %c2_i32 = arith.constant 2 : i32
    %23 = tpu.dynamic_rotate %20 by %c2_i32 dim 0 : vector<16x32xf32>, i32 -> vector<16x32xf32>
    %24 = arith.mulf %23, %21 : vector<16x32xf32>
    %c14_i32 = arith.constant 14 : i32
    %25 = tpu.dynamic_rotate %20 by %c14_i32 dim 0 : vector<16x32xf32>, i32 -> vector<16x32xf32>
    %26 = arith.mulf %25, %22 : vector<16x32xf32>
    %27 = tpu.concatenate %24, %20, %26 in 1 : vector<16x32xf32>, vector<16x32xf32>, vector<16x32xf32> -> vector<16x96xf32>
    %c112 = arith.constant 112 : index
    %c0_12 = arith.constant 0 : index
    %28 = vector.load %arg1[%c112, %c0_12] : memref<408x32xf32, #tpu.memory_space<vmem>>, vector<96x32xf32>
    %c306 = arith.constant 306 : index
    %c0_13 = arith.constant 0 : index
    %29 = vector.load %arg1[%c306, %c0_13] : memref<408x32xf32, #tpu.memory_space<vmem>>, vector<1x32xf32>
    %cst_14 = arith.constant dense<0.000000e+00> : vector<16x32xf32>
    %30 = tpu.matmul %27, %28, %cst_14 {dimension_numbers = #tpu.dot_dimension_numbers<[1], [0], [0], [1], [0, 0, 1, 1], [], []>} : vector<16x96xf32>, vector<96x32xf32>, vector<16x32xf32> -> vector<16x32xf32>
    %31 = vector.broadcast %29 : vector<1x32xf32> to vector<16x32xf32>
    %32 = arith.addf %30, %31 : vector<16x32xf32>
    %cst_15 = arith.constant 0.000000e+00 : f32
    %33 = vector.broadcast %cst_15 : f32 to vector<16x32xf32>
    %34 = arith.maximumf %32, %33 : vector<16x32xf32>
    %35 = arith.addf %34, %20 : vector<16x32xf32>
    %c344 = arith.constant 344 : index
    %c0_16 = arith.constant 0 : index
    %36 = vector.load %arg1[%c344, %c0_16] : memref<408x32xf32, #tpu.memory_space<vmem>>, vector<16x32xf32>
    %c392 = arith.constant 392 : index
    %c0_17 = arith.constant 0 : index
    %37 = vector.load %arg1[%c392, %c0_17] : memref<408x32xf32, #tpu.memory_space<vmem>>, vector<16x32xf32>
    %c4_i32 = arith.constant 4 : i32
    %38 = tpu.dynamic_rotate %35 by %c4_i32 dim 0 : vector<16x32xf32>, i32 -> vector<16x32xf32>
    %39 = arith.mulf %38, %36 : vector<16x32xf32>
    %c12_i32 = arith.constant 12 : i32
    %40 = tpu.dynamic_rotate %35 by %c12_i32 dim 0 : vector<16x32xf32>, i32 -> vector<16x32xf32>
    %41 = arith.mulf %40, %37 : vector<16x32xf32>
    %42 = tpu.concatenate %39, %35, %41 in 1 : vector<16x32xf32>, vector<16x32xf32>, vector<16x32xf32> -> vector<16x96xf32>
    %c208 = arith.constant 208 : index
    %c0_18 = arith.constant 0 : index
    %43 = vector.load %arg1[%c208, %c0_18] : memref<408x32xf32, #tpu.memory_space<vmem>>, vector<96x32xf32>
    %c307 = arith.constant 307 : index
    %c0_19 = arith.constant 0 : index
    %44 = vector.load %arg1[%c307, %c0_19] : memref<408x32xf32, #tpu.memory_space<vmem>>, vector<1x32xf32>
    %cst_20 = arith.constant dense<0.000000e+00> : vector<16x32xf32>
    %45 = tpu.matmul %42, %43, %cst_20 {dimension_numbers = #tpu.dot_dimension_numbers<[1], [0], [0], [1], [0, 0, 1, 1], [], []>} : vector<16x96xf32>, vector<96x32xf32>, vector<16x32xf32> -> vector<16x32xf32>
    %46 = vector.broadcast %44 : vector<1x32xf32> to vector<16x32xf32>
    %47 = arith.addf %45, %46 : vector<16x32xf32>
    %cst_21 = arith.constant 0.000000e+00 : f32
    %48 = vector.broadcast %cst_21 : f32 to vector<16x32xf32>
    %49 = arith.maximumf %47, %48 : vector<16x32xf32>
    %50 = arith.addf %49, %35 : vector<16x32xf32>
    %c0_22 = arith.constant 0 : index
    %c0_23 = arith.constant 0 : index
    %51 = vector.load %arg2[%c0_22, %c0_23] : memref<16x32xf32, #tpu.memory_space<vmem>>, vector<16x32xf32>
    tpu.vector_store %arg2[%c0_22, %c0_23], %50 {strides = array<i32>} : memref<16x32xf32, #tpu.memory_space<vmem>>, vector<16x32xf32>,
    return
  }
}

</mosaic_0001>

<bundles_post_ra>
// kernel: simple_cnn_encoder_forward.1
= control target key start
LH: loop header
LB: loop body
LE: loop exit
PB: predicated region body
PF: predicated region fallthrough
CT: control target
= control target key end

     0   :  { %vm21_vm0 = vcmask 130048   ;;  %s1055_s0 = inlined_call_operand.vmem [shape: f32[16,16], index: 0, kind: input, shape index: {}]   ;;  %s1056_s1 = inlined_call_operand.vmem [shape: f32[408,32], index: 1, kind: input, shape index: {}]   ;;  %s1057_s2 = inlined_call_operand.hbm [shape: f32[16,32], index: 2, kind: output, shape index: {}]  }
   0x1   :  { %v14_v0 = vld [vmem:[%s1056_s1] sm:$0xff]  ;;  %v15_v1 = vld [vmem:[%s1056_s1 + $0x8] sm:$0xff] }
   0x2   :  { %v12_v2 = vld [vmem:[%s1055_s0] sm:$0xff]  ;;  %v687_v3 = vpack.c.bf16 %v15_v1, %v14_v0 }
   0x3   :  { %603 = vmatprep.mubr.msk.f32.mxu0 %vm21_vm0, %v12_v2 }
   0x4   :  { %7 = vsyncpa [#allocation3], 0  ;;  %688 = vmatprep.subr.bf16.mxu0 %v687_v3  ;;  %v13_v4 = vld [vmem:[%s1055_s0 + $0x8] sm:$0xff]  ;;  %v145_v5 = vld [vmem:[%s1056_s1 + $0x10] sm:$0xff]  ;;  %v109_v22 = vlaneseq  ;;  %s792_s14 = smov 32   ;;  %s793_s19 = smov 64  }
   0x5   :  { %690 = vmatpush3.bf16.msra.mxu0 %v687_v3  ;;  %v146_v6 = vld [vmem:[%s1056_s1 + $0x18] sm:$0xff]  ;;  %v147_v7 = vld [vmem:[%s1056_s1 + $0x20] sm:$0xff]  ;;  %v148_v9 = vld [vmem:[%s1056_s1 + $0x28] sm:$0xff]  ;;  %vm139_vm3 = vcmask 261120   ;;  %vm142_vm4 = vcmask 523264   ;;  %vm162_vm5 = vcmask 785408  }
   0x6   :  { %v691_v8 = vpack.c.bf16 %v146_v6, %v145_v5  ;;  %v695_v10 = vpack.c.bf16 %v148_v9, %v147_v7  ;;  %v149_v11 = vld [vmem:[%s1056_s1 + $0x30] sm:$0xff]  ;;  %v150_v12 = vld [vmem:[%s1056_s1 + $0x38] sm:$0xff]  ;;  %v151_v14 = vld [vmem:[%s1056_s1 + $0x40] sm:$0xff]  ;;  %v863_v25 = vshrl.u32 %v109_v22, 7  ;;  %s794_s9 = smov [#allocation2]  }
   0x7   :  { %v699_v13 = vpack.c.bf16 %v150_v12, %v149_v11  ;;  %v152_v15 = vld [vmem:[%s1056_s1 + $0x48] sm:$0xff]  ;;  %v153_v17 = vld [vmem:[%s1056_s1 + $0x50] sm:$0xff]  ;;  %v154_v18 = vld [vmem:[%s1056_s1 + $0x58] sm:$0xff]  ;;  %s530_s10 = sshll.u32 %s794_s9, 4  ;;  %s531_s10 = int_to_ptr.vmem [resolvable:$true] %s530_s10 }
   0x8   :  { %604 = vmatmul.mubr.msk.f32.vlgmr.msra.gmra.mrb[0].mxu0 %vm21_vm0, %v13_v4  ;;  %692 = vmatprep.subr.bf16.mxu1 %v691_v8  ;;  %v703_v16 = vpack.c.bf16 %v152_v15, %v151_v14  ;;  %v707_v19 = vpack.c.bf16 %v154_v18, %v153_v17  ;;  %v155_v20 = vld [vmem:[%s1056_s1 + $0x60] sm:$0xff]  ;;  %v156_v21 = vld [vmem:[%s1056_s1 + $0x68] sm:$0xff]  ;;  %v541_v24 = vld [vmem:[%s1056_s1 + $0x130] ss:$0 sm:$0xff]  ;;  %vm118_vm1 = vcmp.lt.s32.totalorder %v863_v25, 7  ;;  %vm111_vm2 = vcmp.lt.s32.totalorder %v863_v25, 1  ;;  %p773_p1 = scmp.lt.s32.totalorder %s531_s10, %s531_s10 }
   0x9   :  { %694 = vmatpush3.bf16.msra.mxu1 %v691_v8  ;;  %v711_v23 = vpack.c.bf16 %v156_v21, %v155_v20  ;;  %v105_v31 = vld [vmem:[%s1056_s1 + $0x168] sm:$0xff]  ;;  %v106_v35 = vld [vmem:[%s1056_s1 + $0x170] sm:$0xff]  ;;  %v103_v40 = vld [vmem:[%s1056_s1 + $0x138] sm:$0xff]  ;;  %vm261_vm6 = vcmp.lt.s32.totalorder %v863_v25, 6  ;;  %vm254_vm7 = vcmp.lt.s32.totalorder %v863_v25, 2  ;;  %vm394_vm8 = vcmp.lt.s32.totalorder %v863_v25, 4 }
   0xa   :  { %696 = vmatprep.subr.bf16.mxu1 %v695_v10  ;;  %v104_v44 = vld [vmem:[%s1056_s1 + $0x140] sm:$0xff]  ;;  %v286_v54 = vld [vmem:[%s1056_s1 + $0x70] sm:$0xff]  ;;  %v287_v55 = vld [vmem:[%s1056_s1 + $0x78] sm:$0xff]  ;;  %s768_s11 = scalar_lea.vmem %s531_s10, 256 }
   0xb   :  { %v288_v56 = vld [vmem:[%s1056_s1 + $0x80] sm:$0xff]  ;;  %v715_v57 = vpack.c.bf16 %v287_v55, %v286_v54  ;;  %v289_v58 = vld [vmem:[%s1056_s1 + $0x88] sm:$0xff]  ;;  %v290_v60 = vld [vmem:[%s1056_s1 + $0x90] sm:$0xff]  ;;  %p769_p0 = scmp.ne.s32.totalorder %s531_s10, %s768_s11  ;;  %p774_p2 = scmp.lt.s32.totalorder %s768_s11, %s768_s11 }
   0xc   :  { %v719_v59 = vpack.c.bf16 %v289_v58, %v288_v56  ;;  %v291_v61 = vld [vmem:[%s1056_s1 + $0x98] sm:$0xff]  ;;  %v292_v63 = vld [vmem:[%s1056_s1 + $0xa0] sm:$0xff]  ;;  %v293_v0 = vld [vmem:[%s1056_s1 + $0xa8] sm:$0xff] }
   0xd   :  { %698 = vmatpush3.bf16.msra.mxu1 %v695_v10  ;;  %716 = vmatprep.subr.bf16.mxu0 %v715_v57  ;;  %v723_v62 = vpack.c.bf16 %v291_v61, %v290_v60  ;;  %v727_v1 = vpack.c.bf16 %v293_v0, %v292_v63  ;;  %v294_v2 = vld [vmem:[%s1056_s1 + $0xb0] sm:$0xff]  ;;  %v295_v3 = vld [vmem:[%s1056_s1 + $0xb8] sm:$0xff]  ;;  %v296_v5 = vld [vmem:[%s1056_s1 + $0xc0] sm:$0xff]  ;;  %p775_p3 = por %p774_p2, %p773_p1 }
   0xe   :  { %700 = vmatprep.subr.bf16.mxu1 %v699_v13  ;;  %718 = vmatpush3.bf16.msra.mxu0 %v715_v57  ;;  %v731_v4 = vpack.c.bf16 %v295_v3, %v294_v2  ;;  %v297_v6 = vld [vmem:[%s1056_s1 + $0xc8] sm:$0xff]  ;;  %v544_v8 = vld [vmem:[%s1056_s1 + $0x131] ss:$0 sm:$0xff]  ;;  %v251_v18 = vld [vmem:[%s1056_s1 + $0x180] sm:$0xff] }
   0xf   :  { %720 = vmatprep.subr.bf16.mxu0 %v719_v59  ;;  %v735_v7 = vpack.c.bf16 %v297_v6, %v296_v5  ;;  %v250_v20 = vld [vmem:[%s1056_s1 + $0x178] sm:$0xff]  ;;  %v429_v54 = vld [vmem:[%s1056_s1 + $0x110] sm:$0xff]  ;;  %v431_v57 = vld [vmem:[%s1056_s1 + $0x120] sm:$0xff]  ;;  %p776_p4 = pnand %p775_p3, %p769_p0 }
  0x10   :  { %v430_v55 = vld [vmem:[%s1056_s1 + $0x118] sm:$0xff]  ;;  %v432_v58 = vld [vmem:[%s1056_s1 + $0x128] sm:$0xff]  ;;  %v547_v60 = vld [vmem:[%s1056_s1 + $0x132] ss:$0 sm:$0xff] }
  0x11   :  { %702 = vmatpush3.bf16.msra.mxu1 %v699_v13  ;;  %v755_v56 = vpack.c.bf16 %v430_v55, %v429_v54  ;;  %v388_v25 = vld [vmem:[%s1056_s1 + $0x158] sm:$0xff] }
  0x12   :  { %704 = vmatprep.subr.bf16.mxu1 %v703_v16  ;;  %722 = vmatpush3.bf16.msra.mxu0 %v719_v59  ;;  %v759_v59 = vpack.c.bf16 %v432_v58, %v431_v57 }
  0x13   :  { %724 = vmatprep.subr.bf16.mxu0 %v723_v62 }
  0x15   :  { %706 = vmatpush3.bf16.msra.mxu1 %v703_v16 }
  0x16   :  { %708 = vmatprep.subr.bf16.mxu1 %v707_v19  ;;  %726 = vmatpush3.bf16.msra.mxu0 %v723_v62 }
  0x17   :  { %728 = vmatprep.subr.bf16.mxu0 %v727_v1 }
  0x19   :  { %710 = vmatpush3.bf16.msra.mxu1 %v707_v19 }
  0x1a   :  { %712 = vmatprep.subr.bf16.mxu1 %v711_v23  ;;  %730 = vmatpush3.bf16.msra.mxu0 %v727_v1 }
  0x1b   :  { %732 = vmatprep.subr.bf16.mxu0 %v731_v4 }
  0x1d   :  { %714 = vmatpush3.bf16.msra.mxu1 %v711_v23 }
  0x1e   :  { %734 = vmatpush3.bf16.msra.mxu0 %v731_v4 }
  0x1f   :  { %736 = vmatprep.subr.bf16.mxu0 %v735_v7 }
  0x22   :  { %738 = vmatpush3.bf16.msra.mxu0 %v735_v7  ;;  %v391_v7 = vld [vmem:[%s1056_s1 + $0x190] sm:$0xff] }
  0xdb   :  { %v605_v26 = vpop.f32.mrb[0].mxu0 }
  0xdc   :  { %v865_v27 = vadd.f32 %v605_v26, %v541_v24  ;;  %v94_v28 = vpop.f32.mrb[1].mxu0 }
  0xdd   :  { %v867_v29 = vadd.f32 %v541_v24, %v94_v28  ;;  %v249_v28 = vld [vmem:[%s1056_s1 + $0x150] sm:$0xff] }
  0xde   :  { %v117_v30 = vrot.slane %v865_v27, 1  ;;  %v108_v38 = vrot.slane %v865_v27, 7 }
  0xdf   :  { %125 = vrot.lane.b32.xlu0 %v867_v29, %s792_s14  ;;  %v116_v32 = vrot.slane %v867_v29, 1  ;;  %v107_v39 = vrot.slane %v867_v29, 7 }
  0xe1   :  { %v119_v33 = vsel %vm118_vm1, %v116_v32, %v117_v30  ;;  %v120_v36 = vsel %vm118_vm1, %v117_v30, %v116_v32  ;;  %v113_v42 = vsel %vm111_vm2, %v108_v38, %v107_v39  ;;  %v112_v45 = vsel %vm111_vm2, %v107_v39, %v108_v38  ;;  %v248_v30 = vld [vmem:[%s1056_s1 + $0x148] sm:$0xff] }
  0xe2   :  { %v121_v34 = vmul.f32 %v119_v33, %v105_v31  ;;  %v122_v37 = vmul.f32 %v120_v36, %v106_v35  ;;  %v114_v43 = vmul.f32 %v113_v42, %v103_v40  ;;  %v115_v50 = vmul.f32 %v112_v45, %v104_v44  ;;  %v421_v42 = vld [vmem:[%s1056_s1 + $0xd0] sm:$0xff]  ;;  %v423_v44 = vld [vmem:[%s1056_s1 + $0xe0] sm:$0xff] }
  0xe3   :  { %127 = vrot.lane.b32.xlu0 %v865_v27, %s792_s14 }
  0xe4   :  { %133 = vrot.lane.b32.xlu1 %v121_v34, %s793_s19 }
  0xe8   :  { %135 = vrot.lane.b32.xlu1 %v122_v37, %s793_s19 }
 0x151   :  { %v126_v41 = vpop.permute.xlu0 %125 }
 0x152   :  { %v140_v46 = vsel %vm139_vm3, %v114_v43, %v126_v41  ;;  %v422_v43 = vld [vmem:[%s1056_s1 + $0xd8] sm:$0xff] }
 0x153   :  { %v739_v45 = vpack.c.bf16 %v422_v43, %v421_v42 }
 0x155   :  { %v128_v48 = vpop.permute.xlu0 %127  ;;  %740 = vmatprep.subr.bf16.mxu1 %v739_v45 }
 0x156   :  { %v134_v47 = vpop.permute.xlu1 %133  ;;  %v141_v51 = vsel %vm139_vm3, %v115_v50, %v128_v48  ;;  %v425_v48 = vld [vmem:[%s1056_s1 + $0xf0] sm:$0xff] }
 0x157   :  { %v143_v49 = vsel %vm142_vm4, %v140_v46, %v134_v47  ;;  %v424_v46 = vld [vmem:[%s1056_s1 + $0xe8] sm:$0xff] }
 0x158   :  { %630 = vmatprep.mubr.msk.f32.mxu1 %vm162_vm5, %v143_v49  ;;  %v743_v47 = vpack.c.bf16 %v424_v46, %v423_v44  ;;  %v426_v49 = vld [vmem:[%s1056_s1 + $0xf8] sm:$0xff] }
 0x159   :  { %v747_v50 = vpack.c.bf16 %v426_v49, %v425_v48 }
 0x15a   :  { %v136_v52 = vpop.permute.xlu1 %135 }
 0x15b   :  { %v144_v53 = vsel %vm142_vm4, %v141_v51, %v136_v52  ;;  %v427_v51 = vld [vmem:[%s1056_s1 + $0x100] sm:$0xff]  ;;  %v428_v52 = vld [vmem:[%s1056_s1 + $0x108] sm:$0xff] }
 0x15c   :  { %631 = vmatmul.mubr.msk.f32.vlgmr.msra.gmra.mrb[0].mxu1 %vm162_vm5, %v144_v53  ;;  %v751_v53 = vpack.c.bf16 %v428_v52, %v427_v51 }
 0x15d   :  { %742 = vmatpush3.bf16.msra.mxu1 %v739_v45 }
 0x15e   :  { %744 = vmatprep.subr.bf16.mxu1 %v743_v47 }
 0x161   :  { %746 = vmatpush3.bf16.msra.mxu1 %v743_v47 }
 0x162   :  { %748 = vmatprep.subr.bf16.mxu1 %v747_v50 }
 0x165   :  { %750 = vmatpush3.bf16.msra.mxu1 %v747_v50 }
 0x166   :  { %752 = vmatprep.subr.bf16.mxu1 %v751_v53 }
 0x169   :  { %754 = vmatpush3.bf16.msra.mxu1 %v751_v53 }
 0x16a   :  { %756 = vmatprep.subr.bf16.mxu1 %v755_v56 }
 0x16d   :  { %758 = vmatpush3.bf16.msra.mxu1 %v755_v56 }
 0x16e   :  { %760 = vmatprep.subr.bf16.mxu1 %v759_v59 }
 0x171   :  { %762 = vmatpush3.bf16.msra.mxu1 %v759_v59 }
 0x22f   :  { %v632_v9 = vpop.f32.mrb[0].mxu1 }
 0x230   :  { %v241_v10 = vadd.f32 %v632_v9, %v544_v8  ;;  %v235_v11 = vpop.f32.mrb[1].mxu1 }
 0x231   :  { %v236_v12 = vadd.f32 %v544_v8, %v235_v11  ;;  %v390_v8 = vld [vmem:[%s1056_s1 + $0x188] sm:$0xff] }
 0x232   :  { %v245_v13 = vmax.f32 %v241_v10, 0.0 }
 0x233   :  { %v244_v14 = vmax.f32 %v236_v12, 0.0 }
 0x234   :  { %v939_v15 = vadd.f32 %v245_v13, %v865_v27  ;;  %v389_v13 = vld [vmem:[%s1056_s1 + $0x160] sm:$0xff] }
 0x235   :  { %v942_v16 = vadd.f32 %v244_v14, %v867_v29 }
 0x236   :  { %270 = vrot.lane.b32.xlu1 %v939_v15, %s792_s14  ;;  %v260_v17 = vrot.slane %v939_v15, 2  ;;  %v253_v26 = vrot.slane %v939_v15, 6 }
 0x237   :  { %268 = vrot.lane.b32.xlu0 %v942_v16, %s792_s14  ;;  %v259_v19 = vrot.slane %v942_v16, 2  ;;  %v252_v27 = vrot.slane %v942_v16, 6 }
 0x239   :  { %v263_v21 = vsel %vm261_vm6, %v260_v17, %v259_v19  ;;  %v262_v22 = vsel %vm261_vm6, %v259_v19, %v260_v17  ;;  %v255_v29 = vsel %vm254_vm7, %v252_v27, %v253_v26  ;;  %v256_v32 = vsel %vm254_vm7, %v253_v26, %v252_v27 }
 0x23a   :  { %v265_v23 = vmul.f32 %v263_v21, %v251_v18  ;;  %v264_v24 = vmul.f32 %v262_v22, %v250_v20  ;;  %v258_v34 = vmul.f32 %v255_v29, %v249_v28  ;;  %v257_v35 = vmul.f32 %v256_v32, %v248_v30 }
 0x23c   :  { %278 = vrot.lane.b32.xlu1 %v265_v23, %s793_s19  ;;  %276 = vrot.lane.b32.xlu0 %v264_v24, %s793_s19  ;;  %v550_v24 = vld [vmem:[%s1056_s1 + $0x133] ss:$0 sm:$0xff] }
 0x2a8   :  { %v271_v33 = vpop.permute.xlu1 %270 }
 0x2a9   :  { %v269_v31 = vpop.permute.xlu0 %268  ;;  %v283_v36 = vsel %vm139_vm3, %v258_v34, %v271_v33 }
 0x2aa   :  { %v282_v37 = vsel %vm139_vm3, %v257_v35, %v269_v31 }
 0x2ae   :  { %v279_v38 = vpop.permute.xlu1 %278  ;;  %v277_v39 = vpop.permute.xlu0 %276 }
 0x2af   :  { %v285_v40 = vsel %vm142_vm4, %v283_v36, %v279_v38  ;;  %v284_v41 = vsel %vm142_vm4, %v282_v37, %v277_v39 }
 0x2b0   :  { %657 = vmatprep.mubr.msk.f32.mxu0 %vm162_vm5, %v284_v41 }
 0x2b1   :  { %658 = vmatmul.mubr.msk.f32.vlgmr.msra.gmra.mrb[2].mxu0 %vm162_vm5, %v285_v40 }
 0x384   :  { %v659_v61 = vpop.f32.mrb[2].mxu0 }
 0x385   :  { %v381_v62 = vadd.f32 %v659_v61, %v547_v60  ;;  %v375_v63 = vpop.f32.mrb[3].mxu0 }
 0x386   :  { %v376_v0 = vadd.f32 %v547_v60, %v375_v63 }
 0x387   :  { %v385_v1 = vmax.f32 %v381_v62, 0.0 }
 0x388   :  { %v384_v2 = vmax.f32 %v376_v0, 0.0 }
 0x389   :  { %v387_v3 = vadd.f32 %v385_v1, %v939_v15 }
 0x38a   :  { %v386_v4 = vadd.f32 %v384_v2, %v942_v16 }
 0x38b   :  { %v393_v5 = vrot.slane %v387_v3, 4  ;;  %405 = vrot.lane.b32.xlu1 %v387_v3, %s792_s14 }
 0x38c   :  { %v392_v6 = vrot.slane %v386_v4, 4  ;;  %403 = vrot.lane.b32.xlu0 %v386_v4, %s792_s14 }
 0x38e   :  { %v396_v9 = vsel %vm394_vm8, %v393_v5, %v392_v6  ;;  %v395_v10 = vsel %vm394_vm8, %v392_v6, %v393_v5 }
 0x38f   :  { %v400_v11 = vmul.f32 %v396_v9, %v391_v7  ;;  %v399_v12 = vmul.f32 %v395_v10, %v390_v8  ;;  %v397_v16 = vmul.f32 %v396_v9, %v388_v25  ;;  %v398_v17 = vmul.f32 %v395_v10, %v389_v13 }
 0x391   :  { %413 = vrot.lane.b32.xlu1 %v400_v11, %s793_s19  ;;  %411 = vrot.lane.b32.xlu0 %v399_v12, %s793_s19 }
 0x3fd   :  { %v406_v15 = vpop.permute.xlu1 %405 }
 0x3fe   :  { %v404_v14 = vpop.permute.xlu0 %403  ;;  %v418_v18 = vsel %vm139_vm3, %v398_v17, %v406_v15 }
 0x3ff   :  { %v417_v19 = vsel %vm139_vm3, %v397_v16, %v404_v14 }
 0x403   :  { %v414_v20 = vpop.permute.xlu1 %413  ;;  %v412_v21 = vpop.permute.xlu0 %411 }
 0x404   :  { %v420_v22 = vsel %vm142_vm4, %v418_v18, %v414_v20  ;;  %v419_v23 = vsel %vm142_vm4, %v417_v19, %v412_v21 }
 0x405   :  { %684 = vmatprep.mubr.msk.f32.mxu1 %vm162_vm5, %v419_v23 }
 0x406   :  { %685 = vmatmul.mubr.msk.f32.vlgmr.msra.gmra.mrb[2].mxu1 %vm162_vm5, %v420_v22 }
 0x4d9   :  { %v686_v26 = vpop.f32.mrb[2].mxu1 }
 0x4da   :  { %v516_v27 = vadd.f32 %v686_v26, %v550_v24  ;;  %v510_v28 = vpop.f32.mrb[3].mxu1 }
 0x4db   :  { %v511_v29 = vadd.f32 %v550_v24, %v510_v28 }
 0x4dc   :  { %v520_v30 = vmax.f32 %v516_v27, 0.0 }
 0x4dd   :  { %v519_v31 = vmax.f32 %v511_v29, 0.0 }
 0x4de   :  { %v522_v32 = vadd.f32 %v520_v30, %v387_v3 }
 0x4df   :  { %v521_v33 = vadd.f32 %v519_v31, %v386_v4 }
 0x4e0   :  { %524 = vst.msk [vmem:[#allocation2 + $0x8] sm:$0xff] %vm139_vm3, %v522_v32 }
 0x4e1   :  { %523 = vst.msk [vmem:[#allocation2] sm:$0xff] %vm139_vm3, %v521_v33 }
 0x4e2   :  { %779 = shalt.err (!%p776_p4)
}
 0x4e3   :  { %s780_s13 = scalar_lea.hbm %s1057_s2, 256 }
 0x4e4   :  { %p781_p5 = scmp.ne.s32.totalorder %s1057_s2, %s780_s13  ;;  %p784_p6 = scmp.lt.u32.totalorder %s780_s13, %s1057_s2 }
 0x4e6   :  { %p786_p7 = pnand %p784_p6, %p781_p5 }
 0x4e8   :  { %789 = shalt.err (!%p786_p7)
}
 0x4e9   :  { %s795_s20 = smov 128   ;;  %s796_s21 = smov 8  }
 0x4ea   :  { %536 = dma.vmem_to_hbm [thread:$0]  %s531_s10, 256, %s1057_s2, [#allocation3], %s795_s20, %s795_s20, %s796_s21  }
 0x4eb   :  { %790 = dma.done.wait [#allocation3], 256  }
 0x4ec   :  { %791 = vsyncadd [#allocation3], 4294967040 }
 0x4ed   :  { %540 = vsyncpa [#allocation3], 1 }

</bundles_post_ra>
